<compile_context>
chip_gen: v5e
topology: v5e:2x2
jax: 0.10.0
libtpu: 0.0.40
codegen_flags: <defaults>
</compile_context>

<pallas_src>
import functools

import jax
import jax.numpy as jnp
from jax.experimental import pallas as pl
from jax.experimental.pallas import tpu as pltpu


# ----------------------------- Pallas kernels ------------------------------- #

def gcn_fused_kernel(a_ref, x_ref, *refs, num_layers):
    """Whole GCN stack in one kernel; everything resident in VMEM.

    refs = (w_0, s_0, w_1, s_1, ..., w_{L-1}, s_{L-1}, o_ref)
      w_l : (Cin_l, Cout_l) bf16   BN-scale-folded weight
      s_l : (1, Cout_l)     f32    folded shift (beta - mean*scale + b*scale)
    Hidden activations are kept as bf16 values (never touch HBM);
    the final layer is written to o_ref in f32.
    """
    o_ref = refs[-1]
    a = a_ref[...]                       # (N, N)  bf16
    h = x_ref[...]                       # (N, C0) bf16
    for l in range(num_layers):
        w = refs[2 * l][...]             # (Cin, Cout) bf16
        s = refs[2 * l + 1][...]         # (1, Cout)   f32
        cin, cout = w.shape
        if cin <= cout:
            # Aggregate first: the N^2 matmul contracts over the narrower dim.
            ah = jnp.dot(a, h, preferred_element_type=jnp.float32)
            y = jnp.dot(ah.astype(jnp.bfloat16), w,
                        preferred_element_type=jnp.float32)
        else:
            hw = jnp.dot(h, w, preferred_element_type=jnp.float32)
            y = jnp.dot(a, hw.astype(jnp.bfloat16),
                        preferred_element_type=jnp.float32)
        y = y + s                        # folded bias + BN shift
        if l < num_layers - 1:
            h = jnp.maximum(y, 0.0).astype(jnp.bfloat16)   # ReLU, bf16 hidden act
        else:
            o_ref[...] = y.astype(o_ref.dtype)


def gcn_layer_tiled_kernel(a_ref, x_ref, w_ref, s_ref, o_ref, *, apply_relu):
    """One row tile of one fused GCN layer:  O_tile = act((A_tile @ X) @ W' + s').

    The (A@X)@W' ordering makes each row tile fully independent (no shared
    H = X@W' scratch), so the row grid axis can be "parallel".
    """
    ax = jnp.dot(a_ref[...], x_ref[...], preferred_element_type=jnp.float32)
    y = jnp.dot(ax.astype(jnp.bfloat16), w_ref[...],
                preferred_element_type=jnp.float32)
    y = y + s_ref[...]
    if apply_relu:
        y = jnp.maximum(y, 0.0)
    o_ref[...] = y.astype(o_ref.dtype)


# ------------------------------ Pallas wrappers ------------------------------ #

def gcn_forward_fused(x, a_norm, params, eps=1e-5):
    """Single-pallas_call forward for graphs that fit entirely in VMEM."""
    num_layers = len(params["weights"])
    N = x.shape[0]
    cout_last = params["weights"][-1].shape[1]

    a_bf = a_norm.astype(jnp.bfloat16)
    x_bf = x.astype(jnp.bfloat16)
    flat = []
    for w_f, s_f in fold_params(params, eps):
        flat.append(w_f.astype(jnp.bfloat16))
        flat.append(s_f.reshape(1, -1).astype(jnp.float32))

    kernel = functools.partial(gcn_fused_kernel, num_layers=num_layers)
    return pl.pallas_call(
        kernel,
        out_shape=jax.ShapeDtypeStruct((N, cout_last), jnp.float32),
        # no grid: single invocation, all operands placed whole in VMEM
    )(a_bf, x_bf, *flat)


def gcn_layer_tiled(a_bf, x_bf, w_bf, shift, *, apply_relu, out_dtype, tile_n):
    """out = act((a_bf @ x_bf) @ w_bf + shift), row-tiled, parallel grid."""
    n_pad = a_bf.shape[0]
    cin = x_bf.shape[1]
    cout = w_bf.shape[1]
    assert n_pad % tile_n == 0
    kernel = functools.partial(gcn_layer_tiled_kernel, apply_relu=apply_relu)
    return pl.pallas_call(
        kernel,
        out_shape=jax.ShapeDtypeStruct((n_pad, cout), out_dtype),
        grid_spec=pltpu.PrefetchScalarGridSpec(
            num_scalar_prefetch=0,
            grid=(n_pad // tile_n,),
            in_specs=[
                pl.BlockSpec((tile_n, n_pad), lambda i: (i, 0)),   # A row tile (bf16)
                pl.BlockSpec((n_pad, cin),   lambda i: (0, 0)),    # X (grid-invariant, bf16)
                pl.BlockSpec((cin, cout),    lambda i: (0, 0)),    # W' (grid-invariant, bf16)
                pl.BlockSpec((1, cout),      lambda i: (0, 0)),    # folded shift (f32)
            ],
            out_specs=pl.BlockSpec((tile_n, cout), lambda i: (i, 0)),
        ),
        compiler_params=pltpu.CompilerParams(
            dimension_semantics=("parallel",),
            vmem_limit_bytes=64 * 1024 * 1024,   # allow larger row tiles on v5e/v6e
        ),
    )(a_bf, x_bf, w_bf, shift)


def gcn_forward_tiled(x, a_norm, params, eps=1e-5, tile_n=512):
    """Row-tiled per-layer forward for graphs that exceed the fused-VMEM budget."""
    num_layers = len(params["weights"])
    N = x.shape[0]
    tile_n = min(tile_n, _round_up(N, 8))
    n_pad = _round_up(N, tile_n)            # ceil-div row padding (padded rows are
                                            # zero A columns -> never contaminate real rows)
    a_bf = jnp.pad(a_norm, ((0, n_pad - N), (0, n_pad - N))).astype(jnp.bfloat16)
    h = jnp.pad(x, ((0, n_pad - N), (0, 0))).astype(jnp.bfloat16)

    folded = fold_params(params, eps)
    for l, (w_f, s_f) in enumerate(folded):
        last = (l == num_layers - 1)
        h = gcn_layer_tiled(
            a_bf, h,
            w_f.astype(jnp.bfloat16),
            s_f.reshape(1, -1).astype(jnp.float32),
            apply_relu=not last,
            out_dtype=jnp.float32 if last else jnp.bfloat16,  # bf16 hidden acts
            tile_n=tile_n)
        # F.dropout(..., training=False) -> identity
    return h[:N]


def gcn_forward(x, a_norm, params, eps=1e-5, fused_vmem_budget=8 * 1024 * 1024):
    """Eval-mode GCN forward; picks the fully fused kernel when it fits in VMEM."""
    N = x.shape[0]
    max_c = max([x.shape[1]] + [w.shape[1] for w in params["weights"]])
    est = 2 * N * N + 2 * N * x.shape[1] + 8 * N * max_c   # A + X + working activations
    if est <= fused_vmem_budget:
        return gcn_forward_fused(x, a_norm, params, eps)
    return gcn_forward_tiled(x, a_norm, params, eps)


# ------------------------------ plain-JAX glue ------------------------------ #

def _round_up(n, m):
    return (n + m - 1) // m * m


def fold_params(params, eps):
    """Fold eval-mode BN scale into W and bias+BN shift into one additive term."""
    num_layers = len(params["weights"])
    folded = []
    for l in range(num_layers):
        w, b = params["weights"][l], params["biases"][l]
        if l < num_layers - 1:
            gamma, beta = params["bn_gamma"][l], params["bn_beta"][l]
            rm, rv = params["bn_mean"][l], params["bn_var"][l]
            scale = gamma / jnp.sqrt(rv + eps)
            w_f = w * scale[None, :]
            s_f = beta - rm * scale + b * scale
        else:
            w_f = w
            s_f = b
        folded.append((w_f, s_f))
    return folded


def normalize_adj(adj):
    """GCNConv normalization:  D^-1/2 (A + I) D^-1/2  (dense)."""
    N = adj.shape[0]
    a = adj + jnp.eye(N, dtype=adj.dtype)
    deg = jnp.sum(a, axis=1)
    d_inv_sqrt = 1.0 / jnp.sqrt(deg)
    return a * d_inv_sqrt[:, None] * d_inv_sqrt[None, :]


def init_gcn_params(key, in_channels, hidden_channels, out_channels, num_layers):
    dims = [in_channels] + [hidden_channels] * (num_layers - 1) + [out_channels]
    weights, biases = [], []
    bn_gamma, bn_beta, bn_mean, bn_var = [], [], [], []
    for l in range(num_layers):
        key, k_w, k_g, k_b, k_m, k_v = jax.random.split(key, 6)
        fan_in, fan_out = dims[l], dims[l + 1]
        std = (6.0 / (fan_in + fan_out)) ** 0.5              # glorot-style
        weights.append(jax.random.uniform(k_w, (fan_in, fan_out), jnp.float32,
                                          -std, std))
        biases.append(jnp.zeros((fan_out,), jnp.float32))
        if l < num_layers - 1:                               # BN for hidden layers
            bn_gamma.append(1.0 + 0.1 * jax.random.normal(k_g, (fan_out,), jnp.float32))
            bn_beta.append(0.1 * jax.random.normal(k_b, (fan_out,), jnp.float32))
            bn_mean.append(0.1 * jax.random.normal(k_m, (fan_out,), jnp.float32))
            bn_var.append(1.0 + 0.5 * jax.random.uniform(k_v, (fan_out,), jnp.float32))
    return dict(weights=weights, biases=biases, bn_gamma=bn_gamma,
                bn_beta=bn_beta, bn_mean=bn_mean, bn_var=bn_var)


def gcn_forward_ref(x, a_norm, params, eps=1e-5):
    """Pure-JAX f32 reference for correctness checking."""
    num_layers = len(params["weights"])
    for l in range(num_layers - 1):
        h = a_norm @ (x @ params["weights"][l]) + params["biases"][l]
        h = ((h - params["bn_mean"][l]) / jnp.sqrt(params["bn_var"][l] + eps)
             * params["bn_gamma"][l] + params["bn_beta"][l])
        x = jnp.maximum(h, 0.0)
    return a_norm @ (x @ params["weights"][-1]) + params["biases"][-1]


def check_close(out, ref, tol, name):
    err = float(jnp.max(jnp.abs(out - ref)))
    scale = float(jnp.max(jnp.abs(ref)))
    assert err <= tol * scale, (
        f"{name}: max|err|={err:.4g} exceeds tol*max|ref|={tol * scale:.4g}")


def make_graph(k_x, k_adj, n, in_c, density):
    x = jax.random.normal(k_x, (n, in_c), jnp.float32)
    upper = (jax.random.uniform(k_adj, (n, n)) < density).astype(jnp.float32)
    adj = jnp.triu(upper, k=1)
    adj = adj + adj.T
    return x, normalize_adj(adj)


# ----------------------------------- main ----------------------------------- #

if __name__ == "__main__":
    key = jax.random.PRNGKey(0)

    # ---- test 1: toy size (N=128) -> fully fused single-kernel path ---------
    N, in_c, hid_c, out_c, num_layers = 128, 16, 32, 8, 3
    key, k_x, k_adj, k_p = jax.random.split(key, 4)
    x, a_norm = make_graph(k_x, k_adj, N, in_c, density=0.1)
    params = init_gcn_params(k_p, in_c, hid_c, out_c, num_layers)

    fused_fn = jax.jit(functools.partial(gcn_forward, eps=1e-5))
    out = jax.block_until_ready(fused_fn(x, a_norm, params))
    ref = gcn_forward_ref(x, a_norm, params)
    assert out.shape == (N, out_c)
    check_close(out, ref, tol=5e-2, name="fused")          # bf16 A/X/W/acts vs f32 ref

    # ---- test 2: larger graph (N=1000) -> row-tiled per-layer path ----------
    N2, in2, hid2, out2 = 1000, 16, 64, 8
    key, k_x2, k_adj2, k_p2 = jax.random.split(key, 4)
    x2, a2 = make_graph(k_x2, k_adj2, N2, in2, density=0.01)
    params2 = init_gcn_params(k_p2, in2, hid2, out2, 3)

    tiled_fn = jax.jit(functools.partial(gcn_forward_tiled, eps=1e-5, tile_n=512))
    out2_arr = jax.block_until_ready(tiled_fn(x2, a2, params2))
    ref2 = gcn_forward_ref(x2, a2, params2)
    assert out2_arr.shape == (N2, out2)
    check_close(out2_arr, ref2, tol=5e-2, name="tiled")

    print("KERNEL_OK")
</pallas_src>

<mosaic_0001>
module attributes {stable_mosaic.version = 11 : i64} {
  func.func @gcn_fused_kernel(%arg0: memref<128x128xbf16, #tpu.memory_space<vmem>>, %arg1: memref<128x16xbf16, #tpu.memory_space<vmem>>, %arg2: memref<16x32xbf16, #tpu.memory_space<vmem>>, %arg3: memref<1x32xf32, #tpu.memory_space<vmem>>, %arg4: memref<32x32xbf16, #tpu.memory_space<vmem>>, %arg5: memref<1x32xf32, #tpu.memory_space<vmem>>, %arg6: memref<32x8xbf16, #tpu.memory_space<vmem>>, %arg7: memref<1x8xf32, #tpu.memory_space<vmem>>, %arg8: memref<128x8xf32, #tpu.memory_space<vmem>>) attributes {dimension_semantics = [], scalar_prefetch = 0 : i64, scratch_operands = 0 : i64, tpu.core_type = #tpu.core_type<tc>} {
    %c0 = arith.constant 0 : index
    %c0_0 = arith.constant 0 : index
    %0 = vector.load %arg0[%c0, %c0_0] : memref<128x128xbf16, #tpu.memory_space<vmem>>, vector<128x128xbf16>
    %c0_1 = arith.constant 0 : index
    %c0_2 = arith.constant 0 : index
    %1 = vector.load %arg1[%c0_1, %c0_2] : memref<128x16xbf16, #tpu.memory_space<vmem>>, vector<128x16xbf16>
    %c0_3 = arith.constant 0 : index
    %c0_4 = arith.constant 0 : index
    %2 = vector.load %arg2[%c0_3, %c0_4] : memref<16x32xbf16, #tpu.memory_space<vmem>>, vector<16x32xbf16>
    %c0_5 = arith.constant 0 : index
    %c0_6 = arith.constant 0 : index
    %3 = vector.load %arg3[%c0_5, %c0_6] : memref<1x32xf32, #tpu.memory_space<vmem>>, vector<1x32xf32>
    %cst = arith.constant dense<0.000000e+00> : vector<128x16xf32>
    %4 = tpu.matmul %0, %1, %cst {dimension_numbers = #tpu.dot_dimension_numbers<[1], [0], [0], [1], [0, 0, 1, 1], [], []>} : vector<128x128xbf16>, vector<128x16xbf16>, vector<128x16xf32> -> vector<128x16xf32>
    %5 = arith.truncf %4 : vector<128x16xf32> to vector<128x16xbf16>
    %cst_7 = arith.constant dense<0.000000e+00> : vector<128x32xf32>
    %6 = tpu.matmul %5, %2, %cst_7 {dimension_numbers = #tpu.dot_dimension_numbers<[1], [0], [0], [1], [0, 0, 1, 1], [], []>} : vector<128x16xbf16>, vector<16x32xbf16>, vector<128x32xf32> -> vector<128x32xf32>
    %7 = vector.broadcast %3 : vector<1x32xf32> to vector<128x32xf32>
    %8 = arith.addf %6, %7 : vector<128x32xf32>
    %cst_8 = arith.constant 0.000000e+00 : f32
    %9 = vector.broadcast %cst_8 : f32 to vector<128x32xf32>
    %10 = arith.maximumf %8, %9 : vector<128x32xf32>
    %11 = arith.truncf %10 : vector<128x32xf32> to vector<128x32xbf16>
    %c0_9 = arith.constant 0 : index
    %c0_10 = arith.constant 0 : index
    %12 = vector.load %arg4[%c0_9, %c0_10] : memref<32x32xbf16, #tpu.memory_space<vmem>>, vector<32x32xbf16>
    %c0_11 = arith.constant 0 : index
    %c0_12 = arith.constant 0 : index
    %13 = vector.load %arg5[%c0_11, %c0_12] : memref<1x32xf32, #tpu.memory_space<vmem>>, vector<1x32xf32>
    %cst_13 = arith.constant dense<0.000000e+00> : vector<128x32xf32>
    %14 = tpu.matmul %0, %11, %cst_13 {dimension_numbers = #tpu.dot_dimension_numbers<[1], [0], [0], [1], [0, 0, 1, 1], [], []>} : vector<128x128xbf16>, vector<128x32xbf16>, vector<128x32xf32> -> vector<128x32xf32>
    %15 = arith.truncf %14 : vector<128x32xf32> to vector<128x32xbf16>
    %cst_14 = arith.constant dense<0.000000e+00> : vector<128x32xf32>
    %16 = tpu.matmul %15, %12, %cst_14 {dimension_numbers = #tpu.dot_dimension_numbers<[1], [0], [0], [1], [0, 0, 1, 1], [], []>} : vector<128x32xbf16>, vector<32x32xbf16>, vector<128x32xf32> -> vector<128x32xf32>
    %17 = vector.broadcast %13 : vector<1x32xf32> to vector<128x32xf32>
    %18 = arith.addf %16, %17 : vector<128x32xf32>
    %cst_15 = arith.constant 0.000000e+00 : f32
    %19 = vector.broadcast %cst_15 : f32 to vector<128x32xf32>
    %20 = arith.maximumf %18, %19 : vector<128x32xf32>
    %21 = arith.truncf %20 : vector<128x32xf32> to vector<128x32xbf16>
    %c0_16 = arith.constant 0 : index
    %c0_17 = arith.constant 0 : index
    %22 = vector.load %arg6[%c0_16, %c0_17] : memref<32x8xbf16, #tpu.memory_space<vmem>>, vector<32x8xbf16>
    %c0_18 = arith.constant 0 : index
    %c0_19 = arith.constant 0 : index
    %23 = vector.load %arg7[%c0_18, %c0_19] : memref<1x8xf32, #tpu.memory_space<vmem>>, vector<1x8xf32>
    %cst_20 = arith.constant dense<0.000000e+00> : vector<128x8xf32>
    %24 = tpu.matmul %21, %22, %cst_20 {dimension_numbers = #tpu.dot_dimension_numbers<[1], [0], [0], [1], [0, 0, 1, 1], [], []>} : vector<128x32xbf16>, vector<32x8xbf16>, vector<128x8xf32> -> vector<128x8xf32>
    %25 = arith.truncf %24 : vector<128x8xf32> to vector<128x8xbf16>
    %cst_21 = arith.constant dense<0.000000e+00> : vector<128x8xf32>
    %26 = tpu.matmul %0, %25, %cst_21 {dimension_numbers = #tpu.dot_dimension_numbers<[1], [0], [0], [1], [0, 0, 1, 1], [], []>} : vector<128x128xbf16>, vector<128x8xbf16>, vector<128x8xf32> -> vector<128x8xf32>
    %27 = vector.broadcast %23 : vector<1x8xf32> to vector<128x8xf32>
    %28 = arith.addf %26, %27 : vector<128x8xf32>
    %c0_22 = arith.constant 0 : index
    %c0_23 = arith.constant 0 : index
    %29 = vector.load %arg8[%c0_22, %c0_23] : memref<128x8xf32, #tpu.memory_space<vmem>>, vector<128x8xf32>
    tpu.vector_store %arg8[%c0_22, %c0_23], %28 {strides = array<i32>} : memref<128x8xf32, #tpu.memory_space<vmem>>, vector<128x8xf32>,
    return
  }
}

</mosaic_0001>

<bundles_post_ra>
// kernel: gcn_forward.1
= control target key start
LH: loop header
LB: loop body
LE: loop exit
PB: predicated region body
PF: predicated region fallthrough
CT: control target
= control target key end

     0   :  { %vm227_vm0 = vcmask 130048   ;;  %vm402_vm1 = vcmask 261120   ;;  %vm650_vm2 = vcmask 64512   ;;  %s1051_s1 = inlined_call_operand.vmem [shape: bf16[128,16], index: 1, kind: input, shape index: {}]   ;;  %s1052_s0 = inlined_call_operand.vmem [shape: bf16[128,128], index: 0, kind: input, shape index: {}]   ;;  %s1053_s2 = inlined_call_operand.vmem [shape: bf16[16,32], index: 2, kind: input, shape index: {}]   ;;  %s1054_s3 = inlined_call_operand.vmem [shape: f32[1,32], index: 3, kind: input, shape index: {}]   ;;  %s1055_s4 = inlined_call_operand.vmem [shape: bf16[32,32], index: 4, kind: input, shape index: {}]   ;;  %s1056_s5 = inlined_call_operand.vmem [shape: f32[1,32], index: 5, kind: input, shape index: {}]   ;;  %s1057_s6 = inlined_call_operand.vmem [shape: bf16[32,8], index: 6, kind: input, shape index: {}]   ;;  %s1058_s7 = inlined_call_operand.vmem [shape: f32[1,8], index: 7, kind: input, shape index: {}]   ;;  %s1059_s8 = inlined_call_operand.vmem [shape: f32[128,8], index: 8, kind: output, shape index: {}]  }
   0x1   :  { %v794_v0 = vld [vmem:[%s1051_s1 + $0x38] sm:$0xff]  ;;  %v793_v1 = vld [vmem:[%s1051_s1 + $0x30] sm:$0xff]  ;;  %v792_v2 = vld [vmem:[%s1051_s1 + $0x28] sm:$0xff] }
   0x2   :  { %161 = vmatpush.bf16.msra.mxu0 %v794_v0  ;;  %v791_v3 = vld [vmem:[%s1051_s1 + $0x20] sm:$0xff]  ;;  %v790_v4 = vld [vmem:[%s1051_s1 + $0x18] sm:$0xff]  ;;  %v789_v5 = vld [vmem:[%s1051_s1 + $0x10] sm:$0xff] }
   0x3   :  { %v788_v6 = vld [vmem:[%s1051_s1 + $0x8] sm:$0xff]  ;;  %v787_v7 = vld [vmem:[%s1051_s1] sm:$0xff]  ;;  %v890_v10 = vld [vmem:[%s1052_s0 + $0x10] sm:$0xff] }
   0x4   :  { %v878_v8 = vld [vmem:[%s1052_s0] sm:$0xff]  ;;  %v884_v9 = vld [vmem:[%s1052_s0 + $0x8] sm:$0xff]  ;;  %v896_v11 = vld [vmem:[%s1052_s0 + $0x18] sm:$0xff] }
   0x5   :  { %v902_v12 = vld [vmem:[%s1052_s0 + $0x20] sm:$0xff]  ;;  %v908_v13 = vld [vmem:[%s1052_s0 + $0x28] sm:$0xff]  ;;  %v914_v14 = vld [vmem:[%s1052_s0 + $0x30] sm:$0xff] }
   0x6   :  { %162 = vmatpush.bf16.msra.mxu0 %v793_v1  ;;  %v795_v15 = vld [vmem:[%s1053_s2] sm:$0xff]  ;;  %v923_v16 = vld [vmem:[%s1052_s0 + $0x38] sm:$0xff] }
   0x7   :  { %259 = vmatpush.bf16.msra.mxu1 %v795_v15  ;;  %800 = vmatpush.bf16.msra.mxu2 %v795_v15  ;;  %v803_v55 = vld [vmem:[%s1054_s3] ss:$0 sm:$0xff] }
   0xa   :  { %163 = vmatpush.bf16.msra.mxu0 %v792_v2 }
   0xe   :  { %164 = vmatpush.bf16.msra.mxu0 %v791_v3 }
  0x12   :  { %165 = vmatpush.bf16.msra.mxu0 %v790_v4 }
  0x16   :  { %166 = vmatpush.bf16.msra.mxu0 %v789_v5 }
  0x1a   :  { %167 = vmatpush.bf16.msra.mxu0 %v788_v6 }
  0x1e   :  { %168 = vmatpush.bf16.msra.mxu0 %v787_v7 }
  0x21   :  { %169 = vmatmul.bf16.vlgmr.msra.gmra.mxu0 %v878_v8 }
  0x31   :  { %174 = vmatmul.bf16.gmra.mxu0 %v884_v9 }
  0x41   :  { %179 = vmatmul.bf16.gmra.mxu0 %v890_v10 }
  0x51   :  { %184 = vmatmul.bf16.gmra.mxu0 %v896_v11 }
  0x61   :  { %189 = vmatmul.bf16.gmra.mxu0 %v902_v12 }
  0x71   :  { %194 = vmatmul.bf16.gmra.mxu0 %v908_v13 }
  0x81   :  { %199 = vmatmul.bf16.gmra.mxu0 %v914_v14 }
  0x91   :  { %204 = vmatmul.bf16.gmra.mxu0 %v923_v16 }
  0x9e   :  { %v170_v17 = vpop.f32.mrf.mxu0 }
  0xa6   :  { %v172_v18 = vpop.f32.mrf.mxu0 }
  0xa7   :  { %v210_v19 = vpack.c.bf16 %v172_v18, %v170_v17 }
  0xa9   :  { %739 = vmatmul.msk.bf16.vlgmr.msra.gmra.mxu1 %vm227_vm0, %v210_v19 }
  0xae   :  { %v175_v20 = vpop.f32.mrf.mxu0 }
  0xb6   :  { %v177_v21 = vpop.f32.mrf.mxu0 }
  0xb7   :  { %v211_v22 = vpack.c.bf16 %v177_v21, %v175_v20 }
  0xb9   :  { %740 = vmatmul.msk.bf16.gmra.mxu1 %vm227_vm0, %v211_v22 }
  0xbe   :  { %v180_v23 = vpop.f32.mrf.mxu0 }
  0xc6   :  { %v182_v24 = vpop.f32.mrf.mxu0 }
  0xc7   :  { %v212_v25 = vpack.c.bf16 %v182_v24, %v180_v23 }
  0xc9   :  { %741 = vmatmul.msk.bf16.gmra.mxu1 %vm227_vm0, %v212_v25 }
  0xce   :  { %v185_v26 = vpop.f32.mrf.mxu0 }
  0xd6   :  { %v187_v27 = vpop.f32.mrf.mxu0 }
  0xd7   :  { %v213_v28 = vpack.c.bf16 %v187_v27, %v185_v26 }
  0xd9   :  { %742 = vmatmul.msk.bf16.gmra.mxu1 %vm227_vm0, %v213_v28 }
  0xde   :  { %v190_v29 = vpop.f32.mrf.mxu0 }
  0xe6   :  { %v192_v30 = vpop.f32.mrf.mxu0 }
  0xe7   :  { %v214_v31 = vpack.c.bf16 %v192_v30, %v190_v29 }
  0xe9   :  { %743 = vmatmul.msk.bf16.gmra.mxu1 %vm227_vm0, %v214_v31 }
  0xee   :  { %v195_v32 = vpop.f32.mrf.mxu0 }
  0xf6   :  { %v197_v33 = vpop.f32.mrf.mxu0 }
  0xf7   :  { %v215_v34 = vpack.c.bf16 %v197_v33, %v195_v32 }
  0xf9   :  { %744 = vmatmul.msk.bf16.vlgmr.msra.gmra.mxu2 %vm227_vm0, %v215_v34 }
  0xfe   :  { %v200_v35 = vpop.f32.mrf.mxu0 }
 0x106   :  { %v202_v36 = vpop.f32.mrf.mxu0 }
 0x107   :  { %v216_v37 = vpack.c.bf16 %v202_v36, %v200_v35 }
 0x109   :  { %745 = vmatmul.msk.bf16.gmra.mxu2 %vm227_vm0, %v216_v37 }
 0x10e   :  { %v205_v38 = vpop.f32.mrf.mxu0 }
 0x116   :  { %v207_v39 = vpop.f32.mrf.mxu0 }
 0x117   :  { %v217_v40 = vpack.c.bf16 %v207_v39, %v205_v38 }
 0x119   :  { %746 = vmatmul.msk.bf16.gmra.mxu2 %vm227_vm0, %v217_v40 }
 0x126   :  { %v261_v41 = vpop.f32.mrf.mxu1 }
 0x127   :  { %v262_v36 = vadd.f32 %v803_v55, %v261_v41  ;;  %v796_v41 = vld [vmem:[%s1055_s4] sm:$0xff] }
 0x129   :  { %v301_v40 = vmax.f32 %v262_v36, 0.0 }
 0x12e   :  { %v263_v42 = vpop.f32.mrf.mxu1 }
 0x12f   :  { %v264_v33 = vadd.f32 %v803_v55, %v263_v42  ;;  %v797_v42 = vld [vmem:[%s1055_s4 + $0x8] sm:$0xff] }
 0x130   :  { %433 = vmatpush.bf16.msrb.mxu0 %v797_v42  ;;  %801 = vmatpush.bf16.msra.mxu3 %v797_v42 }
 0x131   :  { %v302_v38 = vmax.f32 %v264_v33, 0.0 }
 0x134   :  { %434 = vmatpush.bf16.msrb.mxu0 %v796_v41  ;;  %802 = vmatpush.bf16.msra.mxu3 %v796_v41 }
 0x136   :  { %v266_v43 = vpop.f32.mrf.mxu1 }
 0x137   :  { %v267_v31 = vadd.f32 %v803_v55, %v266_v43 }
 0x139   :  { %v303_v37 = vmax.f32 %v267_v31, 0.0 }
 0x13e   :  { %v268_v44 = vpop.f32.mrf.mxu1 }
 0x13f   :  { %v269_v28 = vadd.f32 %v803_v55, %v268_v44 }
 0x141   :  { %v304_v34 = vmax.f32 %v269_v28, 0.0 }
 0x143   :  { %v318_v39 = vpack.c.bf16 %v304_v34, %v303_v37 }
 0x146   :  { %v271_v45 = vpop.f32.mrf.mxu1 }
 0x147   :  { %v272_v26 = vadd.f32 %v803_v55, %v271_v45 }
 0x149   :  { %v305_v32 = vmax.f32 %v272_v26, 0.0 }
 0x14e   :  { %v273_v47 = vpop.f32.mrf.mxu1 }
 0x14f   :  { %v274_v23 = vadd.f32 %v803_v55, %v273_v47 }
 0x151   :  { %v306_v29 = vmax.f32 %v274_v23, 0.0 }
 0x153   :  { %v319_v35 = vpack.c.bf16 %v306_v29, %v305_v32 }
 0x156   :  { %v276_v49 = vpop.f32.mrf.mxu1 }
 0x157   :  { %v277_v21 = vadd.f32 %v803_v55, %v276_v49 }
 0x159   :  { %v307_v27 = vmax.f32 %v277_v21, 0.0 }
 0x15e   :  { %v278_v52 = vpop.f32.mrf.mxu1 }
 0x15f   :  { %v279_v18 = vadd.f32 %v803_v55, %v278_v52 }
 0x161   :  { %v308_v24 = vmax.f32 %v279_v18, 0.0 }
 0x163   :  { %v320_v30 = vpack.c.bf16 %v308_v24, %v307_v27 }
 0x166   :  { %v281_v54 = vpop.f32.mrf.mxu1 }
 0x167   :  { %v282_v15 = vadd.f32 %v803_v55, %v281_v54 }
 0x169   :  { %v309_v22 = vmax.f32 %v282_v15, 0.0 }
 0x16e   :  { %v283_v2 = vpop.f32.mrf.mxu1 }
 0x16f   :  { %v284_v5 = vadd.f32 %v803_v55, %v283_v2 }
 0x171   :  { %v310_v19 = vmax.f32 %v284_v5, 0.0 }
 0x173   :  { %v321_v25 = vpack.c.bf16 %v310_v19, %v309_v22 }
 0x17c   :  { %v286_v46 = vpop.f32.mrf.mxu2 }
 0x17d   :  { %v287_v3 = vadd.f32 %v803_v55, %v286_v46  ;;  %v317_v46 = vpack.c.bf16 %v302_v38, %v301_v40 }
 0x17f   :  { %v311_v17 = vmax.f32 %v287_v3, 0.0  ;;  %v798_v3 = vld [vmem:[%s1057_s6] sm:$0xff] }
 0x184   :  { %v288_v48 = vpop.f32.mrf.mxu2 }
 0x185   :  { %v289_v63 = vadd.f32 %v803_v55, %v288_v48 }
 0x187   :  { %v312_v6 = vmax.f32 %v289_v63, 0.0 }
 0x189   :  { %v322_v20 = vpack.c.bf16 %v312_v6, %v311_v17 }
 0x18c   :  { %v291_v50 = vpop.f32.mrf.mxu2 }
 0x18d   :  { %v292_v60 = vadd.f32 %v803_v55, %v291_v50 }
 0x18f   :  { %v313_v4 = vmax.f32 %v292_v60, 0.0 }
 0x194   :  { %v293_v51 = vpop.f32.mrf.mxu2 }
 0x195   :  { %v294_v58 = vadd.f32 %v803_v55, %v293_v51 }
 0x197   :  { %v314_v0 = vmax.f32 %v294_v58, 0.0 }
 0x199   :  { %v323_v7 = vpack.c.bf16 %v314_v0, %v313_v4 }
 0x19c   :  { %v296_v53 = vpop.f32.mrf.mxu2 }
 0x19d   :  { %v297_v56 = vadd.f32 %v803_v55, %v296_v53 }
 0x19f   :  { %v315_v61 = vmax.f32 %v297_v56, 0.0 }
 0x1a4   :  { %v298_v57 = vpop.f32.mrf.mxu2 }
 0x1a5   :  { %v299_v59 = vadd.f32 %v803_v55, %v298_v57 }
 0x1a7   :  { %v316_v62 = vmax.f32 %v299_v59, 0.0 }
 0x1a9   :  { %v324_v1 = vpack.c.bf16 %v316_v62, %v315_v61  ;;  %v799_v62 = vld [vmem:[%s1057_s6 + $0x8] sm:$0xff] }
 0x1aa   :  { %547 = vmatpush.bf16.msrb.mxu1 %v799_v62 }
 0x1ab   :  { %330 = vmatpush.bf16.msrb.mxu2 %v324_v1 }
 0x1ae   :  { %548 = vmatpush.bf16.msrb.mxu1 %v798_v3 }
 0x1af   :  { %331 = vmatpush.bf16.msrb.mxu2 %v323_v7  ;;  %v804_v7 = vld [vmem:[%s1056_s5] ss:$0 sm:$0xff] }
 0x1b3   :  { %332 = vmatpush.bf16.msrb.mxu2 %v322_v20 }
 0x1b7   :  { %333 = vmatpush.bf16.msrb.mxu2 %v321_v25 }
 0x1bb   :  { %334 = vmatpush.bf16.msrb.mxu2 %v320_v30 }
 0x1bf   :  { %335 = vmatpush.bf16.msrb.mxu2 %v319_v35 }
 0x1c3   :  { %336 = vmatpush.bf16.msrb.mxu2 %v318_v39 }
 0x1c7   :  { %337 = vmatpush.bf16.msrb.mxu2 %v317_v46 }
 0x1ca   :  { %338 = vmatmul.bf16.vlgmr.msrb.gmra.mxu2 %v878_v8 }
 0x1da   :  { %343 = vmatmul.bf16.gmra.mxu2 %v884_v9 }
 0x1ea   :  { %348 = vmatmul.bf16.gmra.mxu2 %v890_v10 }
 0x1fa   :  { %353 = vmatmul.bf16.gmra.mxu2 %v896_v11 }
 0x20a   :  { %358 = vmatmul.bf16.gmra.mxu2 %v902_v12 }
 0x21a   :  { %363 = vmatmul.bf16.gmra.mxu2 %v908_v13 }
 0x22a   :  { %368 = vmatmul.bf16.gmra.mxu2 %v914_v14 }
 0x23a   :  { %373 = vmatmul.bf16.gmra.mxu2 %v923_v16 }
 0x24d   :  { %v339_v43 = vpop.f32.mrf.mxu2 }
 0x255   :  { %v341_v44 = vpop.f32.mrf.mxu2 }
 0x256   :  { %v379_v45 = vpack.c.bf16 %v341_v44, %v339_v43 }
 0x258   :  { %755 = vmatmul.msk.bf16.vlgmr.msrb.gmra.mxu0 %vm402_vm1, %v379_v45 }
 0x25d   :  { %v344_v47 = vpop.f32.mrf.mxu2 }
 0x265   :  { %v346_v48 = vpop.f32.mrf.mxu2 }
 0x266   :  { %v380_v49 = vpack.c.bf16 %v346_v48, %v344_v47 }
 0x268   :  { %756 = vmatmul.msk.bf16.gmra.mxu0 %vm402_vm1, %v380_v49 }
 0x26d   :  { %v349_v50 = vpop.f32.mrf.mxu2 }
 0x275   :  { %v351_v51 = vpop.f32.mrf.mxu2 }
 0x276   :  { %v381_v52 = vpack.c.bf16 %v351_v51, %v349_v50 }
 0x278   :  { %757 = vmatmul.msk.bf16.gmra.mxu0 %vm402_vm1, %v381_v52 }
 0x27d   :  { %v354_v53 = vpop.f32.mrf.mxu2 }
 0x285   :  { %v356_v54 = vpop.f32.mrf.mxu2 }
 0x286   :  { %v382_v55 = vpack.c.bf16 %v356_v54, %v354_v53 }
 0x288   :  { %758 = vmatmul.msk.bf16.vlgmr.msra.gmra.mxu3 %vm402_vm1, %v382_v55 }
 0x28d   :  { %v359_v56 = vpop.f32.mrf.mxu2 }
 0x295   :  { %v361_v57 = vpop.f32.mrf.mxu2 }
 0x296   :  { %v383_v58 = vpack.c.bf16 %v361_v57, %v359_v56 }
 0x298   :  { %759 = vmatmul.msk.bf16.gmra.mxu3 %vm402_vm1, %v383_v58 }
 0x29d   :  { %v364_v59 = vpop.f32.mrf.mxu2 }
 0x2a5   :  { %v366_v60 = vpop.f32.mrf.mxu2 }
 0x2a6   :  { %v384_v61 = vpack.c.bf16 %v366_v60, %v364_v59 }
 0x2a8   :  { %760 = vmatmul.msk.bf16.gmra.mxu3 %vm402_vm1, %v384_v61 }
 0x2ad   :  { %v369_v63 = vpop.f32.mrf.mxu2 }
 0x2b5   :  { %v371_v0 = vpop.f32.mrf.mxu2 }
 0x2b6   :  { %v385_v1 = vpack.c.bf16 %v371_v0, %v369_v63 }
 0x2b8   :  { %761 = vmatmul.msk.bf16.gmra.mxu3 %vm402_vm1, %v385_v1 }
 0x2bd   :  { %v374_v2 = vpop.f32.mrf.mxu2 }
 0x2c5   :  { %v376_v4 = vpop.f32.mrf.mxu2 }
 0x2c6   :  { %v386_v5 = vpack.c.bf16 %v376_v4, %v374_v2 }
 0x2c8   :  { %762 = vmatmul.msk.bf16.gmra.mxu3 %vm402_vm1, %v386_v5 }
 0x2d5   :  { %v436_v6 = vpop.f32.mrf.mxu0 }
 0x2d6   :  { %v437_v15 = vadd.f32 %v804_v7, %v436_v6 }
 0x2d8   :  { %v476_v19 = vmax.f32 %v437_v15, 0.0 }
 0x2dd   :  { %v438_v17 = vpop.f32.mrf.mxu0 }
 0x2de   :  { %v439_v18 = vadd.f32 %v804_v7, %v438_v17 }
 0x2e0   :  { %v477_v20 = vmax.f32 %v439_v18, 0.0 }
 0x2e2   :  { %v492_v21 = vpack.c.bf16 %v477_v20, %v476_v19 }
 0x2e4   :  { %771 = vmatmul.msk.bf16.vlgmr.msrb.gmra.mxu1 %vm402_vm1, %v492_v21 }
 0x2e5   :  { %v441_v22 = vpop.f32.mrf.mxu0 }
 0x2e6   :  { %v442_v23 = vadd.f32 %v804_v7, %v441_v22 }
 0x2e8   :  { %v478_v26 = vmax.f32 %v442_v23, 0.0 }
 0x2ed   :  { %v443_v24 = vpop.f32.mrf.mxu0 }
 0x2ee   :  { %v444_v25 = vadd.f32 %v804_v7, %v443_v24 }
 0x2f0   :  { %v479_v27 = vmax.f32 %v444_v25, 0.0 }
 0x2f2   :  { %v493_v28 = vpack.c.bf16 %v479_v27, %v478_v26 }
 0x2f4   :  { %772 = vmatmul.msk.bf16.gmra.mxu1 %vm402_vm1, %v493_v28 }
 0x2f5   :  { %v446_v29 = vpop.f32.mrf.mxu0 }
 0x2f6   :  { %v447_v30 = vadd.f32 %v804_v7, %v446_v29 }
 0x2f8   :  { %v480_v33 = vmax.f32 %v447_v30, 0.0 }
 0x2fd   :  { %v448_v31 = vpop.f32.mrf.mxu0 }
 0x2fe   :  { %v449_v32 = vadd.f32 %v804_v7, %v448_v31 }
 0x300   :  { %v481_v34 = vmax.f32 %v449_v32, 0.0 }
 0x302   :  { %v494_v35 = vpack.c.bf16 %v481_v34, %v480_v33 }
 0x304   :  { %773 = vmatmul.msk.bf16.gmra.mxu1 %vm402_vm1, %v494_v35 }
 0x30b   :  { %v451_v36 = vpop.f32.mrf.mxu3 }
 0x30c   :  { %v452_v37 = vadd.f32 %v804_v7, %v451_v36 }
 0x30e   :  { %v482_v40 = vmax.f32 %v452_v37, 0.0 }
 0x313   :  { %v453_v38 = vpop.f32.mrf.mxu3 }
 0x314   :  { %v454_v39 = vadd.f32 %v804_v7, %v453_v38 }
 0x316   :  { %v483_v46 = vmax.f32 %v454_v39, 0.0  ;;  %v805_v39 = vld [vmem:[%s1058_s7] ss:$0 sm:$0xff] }
 0x318   :  { %v495_v42 = vpack.c.bf16 %v483_v46, %v482_v40 }
 0x31a   :  { %774 = vmatmul.msk.bf16.gmra.mxu1 %vm402_vm1, %v495_v42 }
 0x31b   :  { %v456_v41 = vpop.f32.mrf.mxu3 }
 0x31c   :  { %v457_v43 = vadd.f32 %v804_v7, %v456_v41 }
 0x31e   :  { %v484_v47 = vmax.f32 %v457_v43, 0.0 }
 0x323   :  { %v458_v44 = vpop.f32.mrf.mxu3 }
 0x324   :  { %v459_v45 = vadd.f32 %v804_v7, %v458_v44 }
 0x326   :  { %v485_v48 = vmax.f32 %v459_v45, 0.0 }
 0x328   :  { %v496_v49 = vpack.c.bf16 %v485_v48, %v484_v47 }
 0x32a   :  { %775 = vmatmul.msk.bf16.gmra.mxu1 %vm402_vm1, %v496_v49 }
 0x32b   :  { %v461_v50 = vpop.f32.mrf.mxu3 }
 0x32c   :  { %v462_v51 = vadd.f32 %v804_v7, %v461_v50 }
 0x32e   :  { %v486_v54 = vmax.f32 %v462_v51, 0.0 }
 0x333   :  { %v463_v52 = vpop.f32.mrf.mxu3 }
 0x334   :  { %v464_v53 = vadd.f32 %v804_v7, %v463_v52 }
 0x336   :  { %v487_v55 = vmax.f32 %v464_v53, 0.0 }
 0x338   :  { %v497_v56 = vpack.c.bf16 %v487_v55, %v486_v54 }
 0x33a   :  { %776 = vmatmul.msk.bf16.gmra.mxu1 %vm402_vm1, %v497_v56 }
 0x33b   :  { %v466_v57 = vpop.f32.mrf.mxu3 }
 0x33c   :  { %v467_v58 = vadd.f32 %v804_v7, %v466_v57 }
 0x33e   :  { %v488_v61 = vmax.f32 %v467_v58, 0.0 }
 0x343   :  { %v468_v59 = vpop.f32.mrf.mxu3 }
 0x344   :  { %v469_v60 = vadd.f32 %v804_v7, %v468_v59 }
 0x346   :  { %v489_v62 = vmax.f32 %v469_v60, 0.0 }
 0x348   :  { %v498_v63 = vpack.c.bf16 %v489_v62, %v488_v61 }
 0x34a   :  { %777 = vmatmul.msk.bf16.gmra.mxu1 %vm402_vm1, %v498_v63 }
 0x34b   :  { %v471_v0 = vpop.f32.mrf.mxu3 }
 0x34c   :  { %v472_v1 = vadd.f32 %v804_v7, %v471_v0 }
 0x34e   :  { %v490_v4 = vmax.f32 %v472_v1, 0.0 }
 0x353   :  { %v473_v2 = vpop.f32.mrf.mxu3 }
 0x354   :  { %v474_v3 = vadd.f32 %v804_v7, %v473_v2 }
 0x356   :  { %v491_v5 = vmax.f32 %v474_v3, 0.0 }
 0x358   :  { %v499_v6 = vpack.c.bf16 %v491_v5, %v490_v4 }
 0x35a   :  { %778 = vmatmul.msk.bf16.gmra.mxu1 %vm402_vm1, %v499_v6 }
 0x361   :  { %v550_v15 = vpop.f32.mrf.mxu1 }
 0x369   :  { %v552_v17 = vpop.f32.mrf.mxu1 }
 0x36a   :  { %v590_v18 = vpack.c.bf16 %v552_v17, %v550_v15 }
 0x371   :  { %v555_v19 = vpop.f32.mrf.mxu1 }
 0x379   :  { %v557_v20 = vpop.f32.mrf.mxu1 }
 0x37a   :  { %v591_v21 = vpack.c.bf16 %v557_v20, %v555_v19 }
 0x381   :  { %v560_v22 = vpop.f32.mrf.mxu1 }
 0x389   :  { %v562_v23 = vpop.f32.mrf.mxu1 }
 0x38a   :  { %v592_v24 = vpack.c.bf16 %v562_v23, %v560_v22 }
 0x397   :  { %v565_v25 = vpop.f32.mrf.mxu1 }
 0x39f   :  { %v567_v26 = vpop.f32.mrf.mxu1 }
 0x3a0   :  { %v593_v27 = vpack.c.bf16 %v567_v26, %v565_v25 }
 0x3a7   :  { %v570_v28 = vpop.f32.mrf.mxu1 }
 0x3af   :  { %v572_v29 = vpop.f32.mrf.mxu1 }
 0x3b0   :  { %v594_v38 = vpack.c.bf16 %v572_v29, %v570_v28 }
 0x3b7   :  { %v575_v7 = vpop.f32.mrf.mxu1 }
 0x3bf   :  { %v577_v30 = vpop.f32.mrf.mxu1 }
 0x3c0   :  { %v595_v37 = vpack.c.bf16 %v577_v30, %v575_v7 }
 0x3c7   :  { %v580_v31 = vpop.f32.mrf.mxu1 }
 0x3cf   :  { %v582_v32 = vpop.f32.mrf.mxu1 }
 0x3d0   :  { %v596_v36 = vpack.c.bf16 %v582_v32, %v580_v31 }
 0x3d7   :  { %v585_v33 = vpop.f32.mrf.mxu1 }
 0x3df   :  { %v587_v34 = vpop.f32.mrf.mxu1 }
 0x3e0   :  { %v597_v35 = vpack.c.bf16 %v587_v34, %v585_v33 }
 0x3e2   :  { %601 = vmatpush.bf16.msrb.mxu3 %v597_v35 }
 0x3e6   :  { %602 = vmatpush.bf16.msrb.mxu3 %v596_v36 }
 0x3ea   :  { %603 = vmatpush.bf16.msrb.mxu3 %v595_v37 }
 0x3ee   :  { %604 = vmatpush.bf16.msrb.mxu3 %v594_v38 }
 0x3f2   :  { %605 = vmatpush.bf16.msrb.mxu3 %v593_v27 }
 0x3f6   :  { %606 = vmatpush.bf16.msrb.mxu3 %v592_v24 }
 0x3fa   :  { %607 = vmatpush.bf16.msrb.mxu3 %v591_v21 }
 0x3fe   :  { %608 = vmatpush.bf16.msrb.mxu3 %v590_v18 }
 0x401   :  { %609 = vmatmul.bf16.vlgmr.msrb.gmra.mxu3 %v878_v8 }
 0x411   :  { %614 = vmatmul.bf16.gmra.mxu3 %v884_v9 }
 0x421   :  { %619 = vmatmul.bf16.gmra.mxu3 %v890_v10 }
 0x431   :  { %624 = vmatmul.bf16.gmra.mxu3 %v896_v11 }
 0x441   :  { %629 = vmatmul.bf16.gmra.mxu3 %v902_v12 }
 0x451   :  { %634 = vmatmul.bf16.gmra.mxu3 %v908_v13 }
 0x461   :  { %639 = vmatmul.bf16.gmra.mxu3 %v914_v14 }
 0x471   :  { %644 = vmatmul.bf16.gmra.mxu3 %v923_v16 }
 0x484   :  { %v610_v40 = vpop.f32.mrf.mxu3 }
 0x485   :  { %v611_v8 = vadd.f32 %v805_v39, %v610_v40 }
 0x487   :  { %651 = vst.msk [vmem:[%s1059_s8] sm:$0xff] %vm650_vm2, %v611_v8 }
 0x48c   :  { %v612_v9 = vpop.f32.mrf.mxu3 }
 0x48d   :  { %v613_v10 = vadd.f32 %v805_v39, %v612_v9 }
 0x48f   :  { %652 = vst.msk [vmem:[%s1059_s8 + $0x8] sm:$0xff] %vm650_vm2, %v613_v10 }
 0x494   :  { %v615_v11 = vpop.f32.mrf.mxu3 }
 0x495   :  { %v616_v12 = vadd.f32 %v805_v39, %v615_v11 }
 0x497   :  { %653 = vst.msk [vmem:[%s1059_s8 + $0x10] sm:$0xff] %vm650_vm2, %v616_v12 }
 0x49c   :  { %v617_v13 = vpop.f32.mrf.mxu3 }
 0x49d   :  { %v618_v14 = vadd.f32 %v805_v39, %v617_v13 }
 0x49f   :  { %654 = vst.msk [vmem:[%s1059_s8 + $0x18] sm:$0xff] %vm650_vm2, %v618_v14 }
 0x4a4   :  { %v620_v16 = vpop.f32.mrf.mxu3 }
 0x4a5   :  { %v621_v46 = vadd.f32 %v805_v39, %v620_v16 }
 0x4a7   :  { %655 = vst.msk [vmem:[%s1059_s8 + $0x20] sm:$0xff] %vm650_vm2, %v621_v46 }
 0x4ac   :  { %v622_v42 = vpop.f32.mrf.mxu3 }
 0x4ad   :  { %v623_v41 = vadd.f32 %v805_v39, %v622_v42 }
 0x4af   :  { %656 = vst.msk [vmem:[%s1059_s8 + $0x28] sm:$0xff] %vm650_vm2, %v623_v41 }
 0x4b4   :  { %v625_v43 = vpop.f32.mrf.mxu3 }
 0x4b5   :  { %v626_v44 = vadd.f32 %v805_v39, %v625_v43 }
 0x4b7   :  { %657 = vst.msk [vmem:[%s1059_s8 + $0x30] sm:$0xff] %vm650_vm2, %v626_v44 }
 0x4bc   :  { %v627_v45 = vpop.f32.mrf.mxu3 }
 0x4bd   :  { %v628_v47 = vadd.f32 %v805_v39, %v627_v45 }
 0x4bf   :  { %658 = vst.msk [vmem:[%s1059_s8 + $0x38] sm:$0xff] %vm650_vm2, %v628_v47 }
 0x4c4   :  { %v630_v48 = vpop.f32.mrf.mxu3 }
 0x4c5   :  { %v631_v49 = vadd.f32 %v805_v39, %v630_v48 }
 0x4c7   :  { %659 = vst.msk [vmem:[%s1059_s8 + $0x40] sm:$0xff] %vm650_vm2, %v631_v49 }
 0x4cc   :  { %v632_v50 = vpop.f32.mrf.mxu3 }
 0x4cd   :  { %v633_v51 = vadd.f32 %v805_v39, %v632_v50 }
 0x4cf   :  { %660 = vst.msk [vmem:[%s1059_s8 + $0x48] sm:$0xff] %vm650_vm2, %v633_v51 }
 0x4d4   :  { %v635_v52 = vpop.f32.mrf.mxu3 }
 0x4d5   :  { %v636_v53 = vadd.f32 %v805_v39, %v635_v52 }
 0x4d7   :  { %661 = vst.msk [vmem:[%s1059_s8 + $0x50] sm:$0xff] %vm650_vm2, %v636_v53 }
 0x4dc   :  { %v637_v54 = vpop.f32.mrf.mxu3 }
 0x4dd   :  { %v638_v55 = vadd.f32 %v805_v39, %v637_v54 }
 0x4df   :  { %662 = vst.msk [vmem:[%s1059_s8 + $0x58] sm:$0xff] %vm650_vm2, %v638_v55 }
 0x4e4   :  { %v640_v56 = vpop.f32.mrf.mxu3 }
 0x4e5   :  { %v641_v57 = vadd.f32 %v805_v39, %v640_v56 }
 0x4e7   :  { %663 = vst.msk [vmem:[%s1059_s8 + $0x60] sm:$0xff] %vm650_vm2, %v641_v57 }
 0x4ec   :  { %v642_v58 = vpop.f32.mrf.mxu3 }
 0x4ed   :  { %v643_v59 = vadd.f32 %v805_v39, %v642_v58 }
 0x4ef   :  { %664 = vst.msk [vmem:[%s1059_s8 + $0x68] sm:$0xff] %vm650_vm2, %v643_v59 }
 0x4f4   :  { %v645_v60 = vpop.f32.mrf.mxu3 }
 0x4f5   :  { %v646_v61 = vadd.f32 %v805_v39, %v645_v60 }
 0x4f7   :  { %665 = vst.msk [vmem:[%s1059_s8 + $0x70] sm:$0xff] %vm650_vm2, %v646_v61 }
 0x4fc   :  { %v647_v62 = vpop.f32.mrf.mxu3 }
 0x4fd   :  { %v648_v63 = vadd.f32 %v805_v39, %v647_v62 }
 0x4ff   :  { %666 = vst.msk [vmem:[%s1059_s8 + $0x78] sm:$0xff] %vm650_vm2, %v648_v63 }

</bundles_post_ra>
